<compile_context>
chip_gen: v6e
topology: v6e:2x2x1
jax: 0.10.0
libtpu: 0.0.40
codegen_flags: <defaults>
</compile_context>

<pallas_src>
import functools
import re

import jax
import jax.numpy as jnp
from jax.experimental import pallas as pl
from jax.experimental.pallas import tpu as pltpu

_LANES = 128
_SUBLANES = 8
_TILE_BYTES = 4 * 1024 * 1024     # per-stream, per-pipeline-buffer VMEM budget
_VMEM_LIMIT = 32 * 1024 * 1024    # explicit scoped-VMEM limit, safe on all gens


def _tpu_generation():
    """Best-effort TPU major generation (5, 6, 7, ...) or None if unknown."""
    try:
        kind = jax.devices()[0].device_kind
        m = re.search(r"v(\d+)", kind.lower())
        return int(m.group(1)) if m else None
    except Exception:
        return None


def _flatten_lane_slab(a):
    """Flatten to 1-D and view as a lane-dense [rows, 128] slab.

    Only zero-pads when numel is not already a multiple of 128, so the common
    case adds no extra HBM traffic (padded lanes contribute |0-0| = 0)."""
    flat = a.reshape(-1)
    n = flat.shape[0]
    rem = n % _LANES
    if rem != 0:
        flat = jnp.pad(flat, (0, _LANES - rem))
    rows = flat.shape[0] // _LANES
    return flat.reshape(rows, _LANES), n, rows


def _pick_tm(rows, itemsize):
    """Largest row tile: full array if it fits the per-buffer budget, else the
    budget rounded down to a multiple of 16 rows (sublane-pack friendly)."""
    max_tm = max(16, (_TILE_BYTES // (_LANES * itemsize)) // 16 * 16)
    return rows if rows <= max_tm else max_tm


def _l1_partial_sum_kernel(x_ref, y_ref, o_ref, *, rows, tm, blocks_per_core,
                           compute_dtype, has_tail):
    """Accumulate per-lane partial |x-y| sums into a resident (8,128) output."""
    c = pl.program_id(0)   # per-core (parallel) axis
    k = pl.program_id(1)   # sequential reduction axis

    @pl.when(k == 0)
    def _():
        o_ref[...] = jnp.zeros_like(o_ref)

    def accumulate(mask_tail_rows):
        # sub/abs in compute_dtype (native bf16 on v6e/v7x when inputs are
        # bf16), then a single cast to f32 for the accumulation.
        d = jnp.abs(x_ref[...].astype(compute_dtype)
                    - y_ref[...].astype(compute_dtype)).astype(jnp.float32)
        if mask_tail_rows:
            # Zero rows past the end of the (lane-padded) array: covers both a
            # partial tail tile and a fully-OOB (clamped) duplicate tile.
            row0 = (c * blocks_per_core + k) * tm
            row_ids = jax.lax.broadcasted_iota(jnp.int32, d.shape, 0) + row0
            d = jnp.where(row_ids < rows, d, 0.0)
        if tm % _SUBLANES == 0:
            # Fold (tm,128) -> (8,128) with elementwise VPU adds only
            # (no cross-lane reduce in the hot loop).
            partial = d.reshape(tm // _SUBLANES, _SUBLANES, _LANES).sum(axis=0)
        else:
            s = jnp.sum(d, axis=0, keepdims=True)                  # (1, 128)
            partial = jnp.concatenate(
                [s, jnp.zeros((_SUBLANES - 1, _LANES), jnp.float32)], axis=0)
        o_ref[...] = o_ref[...] + partial

    if has_tail:
        # Tail-only masking: full tiles skip the iota/compare/select entirely.
        row0 = (c * blocks_per_core + k) * tm
        is_tail = row0 + tm > rows

        @pl.when(is_tail)
        def _():
            accumulate(True)

        @pl.when(jnp.logical_not(is_tail))
        def _():
            accumulate(False)
    else:
        accumulate(False)


def _l1_elementwise_kernel(x_ref, y_ref, o_ref):
    o_ref[...] = jnp.abs(x_ref[...] - y_ref[...]).astype(o_ref.dtype)


def l1_loss(input, target, size_average=True, reduce=True):
    """Pallas equivalent of ml/iispt_loss.py::l1Loss."""
    assert input.shape == target.shape, "shapes must match (no broadcasting)"
    out_dtype = jnp.result_type(input.dtype, target.dtype)
    gen = _tpu_generation()

    x2d, n, rows = _flatten_lane_slab(input)
    y2d, _, _ = _flatten_lane_slab(target)

    in_itemsize = max(input.dtype.itemsize, target.dtype.itemsize)

    if not reduce:
        # Elementwise |a - b|, same shape & dtype as the (promoted) input.
        out_itemsize = jnp.dtype(out_dtype).itemsize
        tm = _pick_tm(rows, max(in_itemsize, out_itemsize))
        grid = (pl.cdiv(rows, tm),)
        cost = pl.CostEstimate(
            flops=2 * rows * _LANES,
            transcendentals=0,
            bytes_accessed=rows * _LANES * (input.dtype.itemsize
                                            + target.dtype.itemsize
                                            + out_itemsize))
        out2d = pl.pallas_call(
            _l1_elementwise_kernel,
            out_shape=jax.ShapeDtypeStruct((rows, _LANES), out_dtype),
            grid_spec=pltpu.PrefetchScalarGridSpec(
                num_scalar_prefetch=0,
                grid=grid,
                in_specs=[
                    pl.BlockSpec((tm, _LANES), lambda i: (i, 0)),
                    pl.BlockSpec((tm, _LANES), lambda i: (i, 0)),
                ],
                out_specs=pl.BlockSpec((tm, _LANES), lambda i: (i, 0)),
            ),
            compiler_params=pltpu.CompilerParams(
                dimension_semantics=("parallel",),
                vmem_limit_bytes=_VMEM_LIMIT),
            cost_estimate=cost,
        )(x2d, y2d)
        return out2d.reshape(-1)[:n].reshape(input.shape)

    # ---- Reduction path (sum or mean over all elements) ----
    tm = _pick_tm(rows, in_itemsize)
    total_blocks = pl.cdiv(rows, tm)

    # Split the reduction across TensorCores only where there are 2 of them.
    nc = 2 if (gen is not None and gen >= 7 and total_blocks >= 2) else 1
    blocks_per_core = pl.cdiv(total_blocks, nc)
    has_tail = (nc * blocks_per_core * tm) != rows
    needs_clamp = (nc * blocks_per_core) > total_blocks

    # sub/abs dtype: native bf16 on bf16-capable VPUs (v6e/v7x), else f32.
    if (input.dtype == jnp.bfloat16 and target.dtype == jnp.bfloat16
            and gen is not None and gen >= 6):
        compute_dtype = jnp.bfloat16
    else:
        compute_dtype = jnp.float32

    def in_map(c, k):
        blk = c * blocks_per_core + k
        if needs_clamp:
            # The (at most one) fully-OOB step clamps onto the previous valid
            # block of the same core, so the block index is unchanged across
            # consecutive steps and the pipeline can skip the redundant DMA;
            # its contribution is masked to zero inside the kernel.
            blk = jnp.minimum(blk, total_blocks - 1)
        return (blk, 0)

    kernel = functools.partial(
        _l1_partial_sum_kernel, rows=rows, tm=tm,
        blocks_per_core=blocks_per_core, compute_dtype=compute_dtype,
        has_tail=has_tail)

    cost = pl.CostEstimate(
        flops=3 * rows * _LANES,
        transcendentals=0,
        bytes_accessed=rows * _LANES * (input.dtype.itemsize
                                        + target.dtype.itemsize)
                       + nc * _SUBLANES * _LANES * 4)

    partials = pl.pallas_call(
        kernel,
        out_shape=jax.ShapeDtypeStruct((nc * _SUBLANES, _LANES), jnp.float32),
        grid_spec=pltpu.PrefetchScalarGridSpec(
            num_scalar_prefetch=0,
            grid=(nc, blocks_per_core),
            in_specs=[
                pl.BlockSpec((tm, _LANES), in_map),
                pl.BlockSpec((tm, _LANES), in_map),
            ],
            # Each core owns one resident (8,128) accumulator block.
            out_specs=pl.BlockSpec((_SUBLANES, _LANES), lambda c, k: (c, 0)),
        ),
        compiler_params=pltpu.CompilerParams(
            dimension_semantics=("parallel", "arbitrary"),
            vmem_limit_bytes=_VMEM_LIMIT),
        cost_estimate=cost,
    )(x2d, y2d)

    total = jnp.sum(partials)                      # tiny (<=16x128) epilogue
    if size_average:
        total = total * (1.0 / float(n))
    return total.astype(out_dtype)


class IisptLoss:
    def __init__(self, size_average=True):
        self.size_average = size_average


class L1Loss(IisptLoss):
    """JAX/Pallas port of ml/iispt_loss.py::L1Loss (no parameters)."""

    def __init__(self, size_average=True, reduce=True):
        super().__init__(size_average)
        self.reduce = reduce

    def __call__(self, input, target):
        return l1_loss(input, target,
                       size_average=self.size_average, reduce=self.reduce)

    # alias to mirror nn.Module.forward
    forward = __call__


if __name__ == "__main__":
    key = jax.random.PRNGKey(0)
    k1, k2, k3, k4 = jax.random.split(key, 4)
    # NCHW, small shapes
    x = jax.random.normal(k1, (2, 4, 16, 16), dtype=jnp.float32)
    y = jax.random.normal(k2, (2, 4, 16, 16), dtype=jnp.float32)

    # mean (default forward)
    loss_mean = L1Loss(size_average=True, reduce=True)(x, y)
    loss_mean = jax.block_until_ready(loss_mean)
    ref_mean = jnp.mean(jnp.abs(x - y))
    assert jnp.allclose(loss_mean, ref_mean, rtol=1e-5, atol=1e-6), (loss_mean, ref_mean)

    # sum
    loss_sum = L1Loss(size_average=False, reduce=True)(x, y)
    loss_sum = jax.block_until_ready(loss_sum)
    ref_sum = jnp.sum(jnp.abs(x - y))
    assert jnp.allclose(loss_sum, ref_sum, rtol=1e-5, atol=1e-4), (loss_sum, ref_sum)

    # elementwise (reduce=False): shape & dtype preserved
    d = L1Loss(size_average=True, reduce=False)(x, y)
    d = jax.block_until_ready(d)
    ref_d = jnp.abs(x - y)
    assert d.shape == x.shape and d.dtype == x.dtype, (d.shape, d.dtype)
    assert jnp.allclose(d, ref_d, rtol=1e-6, atol=1e-6), "elementwise mismatch"

    # non-128-multiple numel exercises the lane-padding path
    xs = jax.random.normal(k3, (3, 5, 7), dtype=jnp.float32)
    ys = jax.random.normal(k4, (3, 5, 7), dtype=jnp.float32)
    loss_small = jax.block_until_ready(L1Loss()(xs, ys))
    ref_small = jnp.mean(jnp.abs(xs - ys))
    assert jnp.allclose(loss_small, ref_small, rtol=1e-5, atol=1e-6), (loss_small, ref_small)

    # bf16 exercises the native bf16 sub/abs path on v6e/v7x (f32 on v5e)
    xb = x.astype(jnp.bfloat16)
    yb = y.astype(jnp.bfloat16)
    loss_bf16 = jax.block_until_ready(L1Loss()(xb, yb))
    ref_bf16 = jnp.mean(jnp.abs(xb.astype(jnp.float32) - yb.astype(jnp.float32)))
    assert jnp.allclose(jnp.float32(loss_bf16), ref_bf16, rtol=2e-2, atol=2e-2), (
        loss_bf16, ref_bf16)

    print("KERNEL_OK")
</pallas_src>

<mosaic_0001>
module attributes {stable_mosaic.version = 11 : i64} {
  func.func @_l1_partial_sum_kernel(%arg0: i32, %arg1: i32, %arg2: memref<16x128xf32, #tpu.memory_space<vmem>>, %arg3: memref<16x128xf32, #tpu.memory_space<vmem>>, %arg4: memref<8x128xf32, #tpu.memory_space<vmem>>) attributes {dimension_semantics = [#tpu.dimension_semantics<parallel>, #tpu.dimension_semantics<arbitrary>], iteration_bounds = array<i64: 1, 1>, scalar_prefetch = 0 : i64, scratch_operands = 0 : i64, tpu.core_type = #tpu.core_type<tc>, window_params = [{transform_indices = @transform_0, window_bounds = array<i64: 16, 128>}, {transform_indices = @transform_1, window_bounds = array<i64: 16, 128>}, {transform_indices = @transform_2, window_bounds = array<i64: 8, 128>}]} {
    %c0_i32 = arith.constant 0 : i32
    %0 = arith.cmpi eq, %arg1, %c0_i32 : i32
    %1 = arith.extui %0 : i1 to i32
    %c0_i32_0 = arith.constant 0 : i32
    %2 = arith.cmpi ne, %1, %c0_i32_0 : i32
    scf.if %2 {
      %cst_8 = arith.constant 0.000000e+00 : f32
      %12 = vector.broadcast %cst_8 : f32 to vector<8x128xf32>
      %c0_9 = arith.constant 0 : index
      %c0_10 = arith.constant 0 : index
      %13 = vector.load %arg4[%c0_9, %c0_10] : memref<8x128xf32, #tpu.memory_space<vmem>>, vector<8x128xf32>
      tpu.vector_store %arg4[%c0_9, %c0_10], %12 {strides = array<i32>} : memref<8x128xf32, #tpu.memory_space<vmem>>, vector<8x128xf32>,
    } else {
    }
    %c0 = arith.constant 0 : index
    %c0_1 = arith.constant 0 : index
    %3 = vector.load %arg2[%c0, %c0_1] : memref<16x128xf32, #tpu.memory_space<vmem>>, vector<16x128xf32>
    %c0_2 = arith.constant 0 : index
    %c0_3 = arith.constant 0 : index
    %4 = vector.load %arg3[%c0_2, %c0_3] : memref<16x128xf32, #tpu.memory_space<vmem>>, vector<16x128xf32>
    %5 = arith.subf %3, %4 : vector<16x128xf32>
    %6 = math.absf %5 : vector<16x128xf32>
    %7 = vector.shape_cast %6 : vector<16x128xf32> to vector<2x8x128xf32>
    %cst = arith.constant dense<0.000000e+00> : vector<8x128xf32>
    %8 = vector.multi_reduction <add>, %7, %cst [0] : vector<2x8x128xf32> to vector<8x128xf32>
    %c0_4 = arith.constant 0 : index
    %c0_5 = arith.constant 0 : index
    %9 = vector.load %arg4[%c0_4, %c0_5] : memref<8x128xf32, #tpu.memory_space<vmem>>, vector<8x128xf32>
    %10 = arith.addf %9, %8 : vector<8x128xf32>
    %c0_6 = arith.constant 0 : index
    %c0_7 = arith.constant 0 : index
    %11 = vector.load %arg4[%c0_6, %c0_7] : memref<8x128xf32, #tpu.memory_space<vmem>>, vector<8x128xf32>
    tpu.vector_store %arg4[%c0_6, %c0_7], %10 {strides = array<i32>} : memref<8x128xf32, #tpu.memory_space<vmem>>, vector<8x128xf32>,
    return
  }
  func.func @transform_0(%arg0: i32, %arg1: i32) -> (i32, i32) {
    %c1_i32 = arith.constant 1 : i32
    %0 = arith.muli %arg0, %c1_i32 : i32
    %1 = arith.addi %0, %arg1 : i32
    %c0_i32 = arith.constant 0 : i32
    %c0_i32_0 = arith.constant 0 : i32
    return %1, %c0_i32 : i32, i32
  }
  func.func @transform_1(%arg0: i32, %arg1: i32) -> (i32, i32) {
    %c1_i32 = arith.constant 1 : i32
    %0 = arith.muli %arg0, %c1_i32 : i32
    %1 = arith.addi %0, %arg1 : i32
    %c0_i32 = arith.constant 0 : i32
    %c0_i32_0 = arith.constant 0 : i32
    return %1, %c0_i32 : i32, i32
  }
  func.func @transform_2(%arg0: i32, %arg1: i32) -> (i32, i32) {
    %c0_i32 = arith.constant 0 : i32
    %c0_i32_0 = arith.constant 0 : i32
    return %arg0, %c0_i32 : i32, i32
  }
}

</mosaic_0001>

<bundles_post_ra>
// kernel: tpu_custom_call.1
= control target key start
LH: loop header
LB: loop body
LE: loop exit
PB: predicated region body
PF: predicated region fallthrough
CT: control target
= control target key end

     0   :  { %7 = vsyncpa [#allocation3], 0  ;;  %s186_s0 = inlined_call_operand.hbm [shape: f32[16,128], index: 0, kind: input, shape index: {}]   ;;  %s187_s1 = inlined_call_operand.hbm [shape: f32[16,128], index: 1, kind: input, shape index: {}]   ;;  %s188_s2 = inlined_call_operand.hbm [shape: f32[8,128], index: 2, kind: output, shape index: {}]  }
   0x1   :  { %8 = vsyncpa [#allocation6], 0 }
   0x2   :  { %9 = vsyncpa [#allocation4], 0  ;;  %s157_s9 = smov [#allocation2]  }
   0x3   :  { %s19_s10 = sshll.u32 %s157_s9, 4  ;;  %s20_s10 = int_to_ptr.vmem [resolvable:$true] %s19_s10 }
   0x4   :  { %s99_s11 = scalar_lea.vmem %s20_s10, 256  ;;  %p104_p1 = scmp.lt.s32.totalorder %s20_s10, %s20_s10 }
   0x5   :  { %p100_p0 = scmp.ne.s32.totalorder %s20_s10, %s99_s11  ;;  %p105_p2 = scmp.lt.s32.totalorder %s99_s11, %s99_s11 }
   0x7   :  { %p106_p3 = por %p105_p2, %p104_p1 }
   0x9   :  { %p107_p4 = pnand %p106_p3, %p100_p0 }
   0xb   :  { %110 = shalt.err (!%p107_p4)
}
   0xc   :  { %s158_s12 = smov 128   ;;  %s159_s13 = smov 8  }
   0xd   :  { %25 = dma.hbm_to_vmem [thread:$0]  %s186_s0, 256, %s20_s10, [#allocation3], %s158_s12, %s158_s12, %s159_s13  }
   0xe   :  { %s160_s16 = smov [#allocation5]  }
   0xf   :  { %s35_s17 = sshll.u32 %s160_s16, 4  ;;  %s36_s17 = int_to_ptr.vmem [resolvable:$true] %s35_s17 }
  0x10   :  { %s119_s18 = scalar_lea.vmem %s36_s17, 256  ;;  %p124_p6 = scmp.lt.s32.totalorder %s36_s17, %s36_s17 }
  0x11   :  { %p120_p5 = scmp.ne.s32.totalorder %s36_s17, %s119_s18  ;;  %p125_p7 = scmp.lt.s32.totalorder %s119_s18, %s119_s18 }
  0x13   :  { %p126_p8 = por %p125_p7, %p124_p6 }
  0x15   :  { %p127_p9 = pnand %p126_p8, %p120_p5 }
  0x17   :  { %130 = shalt.err (!%p127_p9)
}
  0x18   :  { %41 = dma.hbm_to_vmem [thread:$0]  %s187_s1, 256, %s36_s17, [#allocation6], %s158_s12, %s158_s12, %s159_s13  }
  0x19   :  { %151 = dma.done.wait [#allocation3], 256  }
  0x1a   :  { %152 = vsyncadd [#allocation3], 4294967040 }
  0x1b   :  { %153 = dma.done.wait [#allocation6], 256  }
  0x1c   :  { %154 = vsyncadd [#allocation6], 4294967040  ;;  %v57_v0 = vld [vmem:[#allocation2] sm:$0xff]  ;;  %v58_v1 = vld [vmem:[#allocation2 + $0x8] sm:$0xff]  ;;  %s161_s0 = smov [#allocation7]  }
  0x1d   :  { %v59_v2 = vld [vmem:[#allocation5] sm:$0xff]  ;;  %v60_v3 = vld [vmem:[#allocation5 + $0x8] sm:$0xff]  ;;  %s75_s21 = sshll.u32 %s161_s0, 4  ;;  %s76_s21 = int_to_ptr.vmem [resolvable:$true] %s75_s21 }
  0x1e   :  { %v61_v4 = vsub.f32 %v57_v0, %v59_v2  ;;  %v62_v5 = vsub.f32 %v58_v1, %v60_v3  ;;  %s131_s22 = scalar_lea.vmem %s76_s21, 128  ;;  %p136_p11 = scmp.lt.s32.totalorder %s76_s21, %s76_s21 }
  0x1f   :  { %p132_p10 = scmp.ne.s32.totalorder %s76_s21, %s131_s22  ;;  %p137_p12 = scmp.lt.s32.totalorder %s131_s22, %s131_s22 }
  0x20   :  { %v63_v6 = vand.u32 2147483647, %v61_v4  ;;  %v64_v7 = vand.u32 2147483647, %v62_v5 }
  0x21   :  { %p138_p13 = por %p137_p12, %p136_p11 }
  0x22   :  { %v65_v8 = vadd.f32 %v64_v7, %v63_v6 }
  0x23   :  { %p139_p0 = pnand %p138_p13, %p132_p10 }
  0x24   :  { %68 = vst [vmem:[#allocation7] sm:$0xff] %v65_v8 }
  0x25   :  { %142 = shalt.err (!%p139_p0)
}
  0x26   :  { %78 = dma.vmem_to_hbm [thread:$0]  %s76_s21, 128, %s188_s2, [#allocation4]  }
  0x27   :  { %155 = dma.done.wait [#allocation4], 128  }
  0x28   :  { %156 = vsyncadd [#allocation4], 4294967168 }
  0x29   :  { %82 = vsyncpa [#allocation3], 1 }
  0x2a   :  { %83 = vsyncpa [#allocation6], 1 }
  0x2b   :  { %84 = vsyncpa [#allocation4], 1 }

</bundles_post_ra>
